<compile_context>
chip_gen: v7x
topology: tpu7x:2x2x1
jax: 0.10.0
libtpu: 0.0.40
codegen_flags: <defaults>
</compile_context>

<pallas_src>
import math

import numpy as np
import jax
import jax.numpy as jnp
from jax.experimental import pallas as pl
from jax.experimental.pallas import tpu as pltpu


def make_positional_encoding(d_model: int, max_len: int = 5000) -> jnp.ndarray:
    """Reference sinusoidal PE buffer, shape (max_len, 1, d_model) (matches PyTorch)."""
    position = jnp.arange(0, max_len, dtype=jnp.float32)[:, None]
    div_term = jnp.exp(
        jnp.arange(0, d_model, 2, dtype=jnp.float32) * (-math.log(10000.0) / d_model)
    )
    angles = position * div_term
    pe = jnp.zeros((max_len, d_model), dtype=jnp.float32)
    pe = pe.at[:, 0::2].set(jnp.sin(angles))
    pe = pe.at[:, 1::2].set(jnp.cos(angles))
    return pe[:, None, :]


def _column_constants_np(d_model: int):
    """Per-column (inv_freq, phase) so pe[pos, col] = sin(pos*inv_freq + phase)."""
    col = np.arange(d_model)
    even_col = (col // 2) * 2
    inv_freq = np.exp(even_col * (-math.log(10000.0) / d_model)).astype(np.float32)
    phase = ((col % 2) * (np.pi / 2.0)).astype(np.float32)  # sin(x + pi/2) == cos(x)
    return inv_freq, phase


def _pe_table_np(d_model: int, length: int) -> np.ndarray:
    """Exact PyTorch pe table, shape (length, d_model), built at trace time."""
    position = np.arange(length, dtype=np.float32)[:, None]
    div_term = np.exp(
        np.arange(0, d_model, 2, dtype=np.float32) * (-math.log(10000.0) / d_model)
    )
    pe = np.zeros((length, d_model), dtype=np.float32)
    pe[:, 0::2] = np.sin(position * div_term)
    pe[:, 1::2] = np.cos(position * div_term)
    return pe


def _pe_add_rowmajor_kernel(x_ref, inv_freq_ref, phase_ref, o_ref):
    """x_ref/o_ref: (tile_s, B*D); rows are sequence positions.

    inv_freq_ref/phase_ref: (1, B*D) compile-time per-column constants
    (the length-D pattern tiled B times) -- sublane-broadcast over the tile.
    """
    tile_s = x_ref.shape[0]
    s0 = pl.program_id(0) * tile_s
    # Padded rows past S (last partial block) compute garbage positions; they
    # are never stored, so no masking is needed.
    pos = (s0 + jax.lax.broadcasted_iota(jnp.int32, x_ref.shape, 0)).astype(jnp.float32)
    # Single transcendental per element; exp/cos/select are gone.
    pe = jnp.sin(pos * inv_freq_ref[...] + phase_ref[...])
    o_ref[...] = (x_ref[...].astype(jnp.float32) + pe).astype(o_ref.dtype)


def _pe_add_table_kernel(x_ref, pe_ref, o_ref):
    """x_ref/o_ref: (tile_s, B, D); pe_ref: (tile_s, 1, D) sublane-broadcast over B."""
    o_ref[...] = (x_ref[...].astype(jnp.float32) + pe_ref[...]).astype(o_ref.dtype)


def _choose_tile_s(seq_len: int, bytes_per_row: int,
                   target_bytes: int = 4 * 1024 * 1024,
                   min_blocks: int = 8, align: int = 32) -> int:
    """Rows-of-sequence per block: ~4 MiB blocks, multiple of 32 (dtype-agnostic
    sublane alignment), capped so the grid has several steps when S is large
    enough (>= 2 blocks lets dimension_semantics=('parallel',) use both v7x TCs)."""
    tile = max(1, target_bytes // max(1, bytes_per_row))
    tile = min(tile, max(align, pl.cdiv(seq_len, min_blocks)))
    if tile >= seq_len:
        return seq_len
    return max(8, (tile // align) * align)


def positional_encoding_forward(x: jnp.ndarray,
                                max_len: int = 5000,
                                tile_s: int | None = None) -> jnp.ndarray:
    """x: (S, B, D). Returns x + sinusoidal_pe[:S] broadcast over the batch axis."""
    S, B, D = x.shape
    assert S <= max_len, "sequence length exceeds max_len"
    assert D % 2 == 0, "d_model must be even (matches the PyTorch module)"
    itemsize = jnp.dtype(x.dtype).itemsize

    cparams = pltpu.CompilerParams(
        dimension_semantics=("parallel",),
        vmem_limit_bytes=32 * 1024 * 1024,
    )

    if B % 8 == 0:
        # Batch-sublane path: (tile_s, B, D) blocks, precomputed (S, 1, D) pe
        # slab streamed alongside x and broadcast over the B sublanes.
        # Zero in-kernel transcendentals; extra HBM read is S*D*4 bytes
        # (<= 1/(2B) of x traffic for B >= 8).
        ts = tile_s if tile_s is not None else _choose_tile_s(S, B * D * itemsize)
        grid = (pl.cdiv(S, ts),)
        pe_slab = jnp.asarray(_pe_table_np(D, S)).reshape(S, 1, D)

        return pl.pallas_call(
            _pe_add_table_kernel,
            out_shape=jax.ShapeDtypeStruct((S, B, D), x.dtype),
            grid=grid,
            in_specs=[
                pl.BlockSpec((ts, B, D), lambda i: (i, 0, 0)),
                pl.BlockSpec((ts, 1, D), lambda i: (i, 0, 0)),
            ],
            out_specs=pl.BlockSpec((ts, B, D), lambda i: (i, 0, 0)),
            compiler_params=cparams,
            cost_estimate=pl.CostEstimate(
                flops=S * B * D,
                transcendentals=0,
                bytes_accessed=2 * S * B * D * itemsize + S * D * 4,
            ),
        )(x, pe_slab)

    # Row-major path (small / unaligned batch): lane axis = B*D, position is a
    # pure row iota (no per-element divide by B), pe synthesized in-kernel so
    # no pe table is streamed from HBM (best for v5e bandwidth).
    W = B * D
    x2 = x.reshape(S, W)
    ts = tile_s if tile_s is not None else _choose_tile_s(S, W * itemsize)
    grid = (pl.cdiv(S, ts),)

    inv_freq, phase = _column_constants_np(D)
    inv_freq_row = jnp.asarray(np.tile(inv_freq, B)).reshape(1, W)
    phase_row = jnp.asarray(np.tile(phase, B)).reshape(1, W)

    out2 = pl.pallas_call(
        _pe_add_rowmajor_kernel,
        out_shape=jax.ShapeDtypeStruct((S, W), x.dtype),
        grid=grid,
        in_specs=[
            pl.BlockSpec((ts, W), lambda i: (i, 0)),
            pl.BlockSpec((1, W), lambda i: (0, 0)),
            pl.BlockSpec((1, W), lambda i: (0, 0)),
        ],
        out_specs=pl.BlockSpec((ts, W), lambda i: (i, 0)),
        compiler_params=cparams,
        cost_estimate=pl.CostEstimate(
            flops=3 * S * W,              # angle mul + phase add + x add
            transcendentals=S * W,        # one sin per element
            bytes_accessed=2 * S * W * itemsize + 2 * W * 4,
        ),
    )(x2, inv_freq_row, phase_row)
    return out2.reshape(S, B, D)


if __name__ == "__main__":
    fwd = jax.jit(positional_encoding_forward, static_argnames=("max_len", "tile_s"))

    # Test 1: small-batch path (B < 8 -> (S, B*D) row-major kernel, in-kernel sin).
    S1, B1, D1 = 8, 2, 32
    x1 = jax.random.normal(jax.random.PRNGKey(0), (S1, B1, D1), dtype=jnp.float32)
    out1 = jax.block_until_ready(fwd(x1, max_len=64))
    ref1 = x1 + make_positional_encoding(D1, 64)[:S1]
    assert out1.shape == (S1, B1, D1)
    assert jnp.allclose(out1, ref1, atol=1e-4, rtol=1e-5), \
        float(jnp.max(jnp.abs(out1 - ref1)))

    # Test 2: batch-sublane path (B % 8 == 0 -> 3-D blocks + streamed pe slab);
    # tile_s=16 forces a 4-step grid so the tiled/pipelined path is exercised.
    S2, B2, D2 = 64, 8, 128
    x2 = jax.random.normal(jax.random.PRNGKey(1), (S2, B2, D2), dtype=jnp.float32)
    out2 = jax.block_until_ready(fwd(x2, max_len=128, tile_s=16))
    ref2 = x2 + make_positional_encoding(D2, 128)[:S2]
    assert out2.shape == (S2, B2, D2)
    assert jnp.allclose(out2, ref2, atol=1e-4, rtol=1e-5), \
        float(jnp.max(jnp.abs(out2 - ref2)))

    print("KERNEL_OK")
</pallas_src>

<mosaic_0001>
module attributes {stable_mosaic.version = 11 : i64} {
  func.func @_pe_add_rowmajor_kernel(%arg0: i32, %arg1: memref<8x64xf32, #tpu.memory_space<vmem>>, %arg2: memref<1x64xf32, #tpu.memory_space<vmem>>, %arg3: memref<1x64xf32, #tpu.memory_space<vmem>>, %arg4: memref<8x64xf32, #tpu.memory_space<vmem>>) attributes {dimension_semantics = [#tpu.dimension_semantics<parallel>], iteration_bounds = array<i64: 1>, scalar_prefetch = 0 : i64, scratch_operands = 0 : i64, tpu.core_type = #tpu.core_type<tc>, window_params = [{transform_indices = @transform_0, window_bounds = array<i64: 8, 64>}, {pipeline_mode = #tpu.pipeline_mode<synchronous>, transform_indices = @transform_1, window_bounds = array<i64: 1, 64>}, {pipeline_mode = #tpu.pipeline_mode<synchronous>, transform_indices = @transform_2, window_bounds = array<i64: 1, 64>}, {transform_indices = @transform_3, window_bounds = array<i64: 8, 64>}]} {
    %c8_i32 = arith.constant 8 : i32
    %0 = arith.muli %arg0, %c8_i32 : i32
    %1 = tpu.iota {dimensions = array<i32: 0>} : vector<8x64xi32>
    %2 = vector.broadcast %0 : i32 to vector<8x64xi32>
    %3 = arith.addi %2, %1 : vector<8x64xi32>
    %4 = arith.sitofp %3 : vector<8x64xi32> to vector<8x64xf32>
    %c0 = arith.constant 0 : index
    %c0_0 = arith.constant 0 : index
    %5 = vector.load %arg2[%c0, %c0_0] : memref<1x64xf32, #tpu.memory_space<vmem>>, vector<1x64xf32>
    %6 = vector.broadcast %5 : vector<1x64xf32> to vector<8x64xf32>
    %7 = arith.mulf %4, %6 : vector<8x64xf32>
    %c0_1 = arith.constant 0 : index
    %c0_2 = arith.constant 0 : index
    %8 = vector.load %arg3[%c0_1, %c0_2] : memref<1x64xf32, #tpu.memory_space<vmem>>, vector<1x64xf32>
    %9 = vector.broadcast %8 : vector<1x64xf32> to vector<8x64xf32>
    %10 = arith.addf %7, %9 : vector<8x64xf32>
    %11 = math.sin %10 : vector<8x64xf32>
    %c0_3 = arith.constant 0 : index
    %c0_4 = arith.constant 0 : index
    %12 = vector.load %arg1[%c0_3, %c0_4] : memref<8x64xf32, #tpu.memory_space<vmem>>, vector<8x64xf32>
    %13 = arith.addf %12, %11 : vector<8x64xf32>
    %c0_5 = arith.constant 0 : index
    %c0_6 = arith.constant 0 : index
    %14 = vector.load %arg4[%c0_5, %c0_6] : memref<8x64xf32, #tpu.memory_space<vmem>>, vector<8x64xf32>
    tpu.vector_store %arg4[%c0_5, %c0_6], %13 {strides = array<i32>} : memref<8x64xf32, #tpu.memory_space<vmem>>, vector<8x64xf32>,
    return
  }
  func.func @transform_0(%arg0: i32) -> (i32, i32) {
    %c0_i32 = arith.constant 0 : i32
    %c0_i32_0 = arith.constant 0 : i32
    return %arg0, %c0_i32 : i32, i32
  }
  func.func @transform_1(%arg0: i32) -> (i32, i32) {
    %c0_i32 = arith.constant 0 : i32
    %c0_i32_0 = arith.constant 0 : i32
    %c0_i32_1 = arith.constant 0 : i32
    return %c0_i32, %c0_i32_0 : i32, i32
  }
  func.func @transform_2(%arg0: i32) -> (i32, i32) {
    %c0_i32 = arith.constant 0 : i32
    %c0_i32_0 = arith.constant 0 : i32
    %c0_i32_1 = arith.constant 0 : i32
    return %c0_i32, %c0_i32_0 : i32, i32
  }
  func.func @transform_3(%arg0: i32) -> (i32, i32) {
    %c0_i32 = arith.constant 0 : i32
    %c0_i32_0 = arith.constant 0 : i32
    return %arg0, %c0_i32 : i32, i32
  }
}

</mosaic_0001>

<bundles_post_ra>
// kernel: positional_encoding_forward.1
= control target key start
LH: loop header
LB: loop body
LE: loop exit
PB: predicated region body
PF: predicated region fallthrough
CT: control target
= control target key end

     0   :  { %v15_v0 = vlaneseq  ;;  %v168_v18 = vmov 683565275   ;;  %v169_v20 = vmov 2475754826   ;;  %v170_v22 = vmov 2131351028   ;;  %s227_s1 = inlined_call_operand.vmem [shape: f32[1,64], index: 1, kind: input, shape index: {}]   ;;  %s228_s2 = inlined_call_operand.vmem [shape: f32[1,64], index: 2, kind: input, shape index: {}]   ;;  %s229_s0 = inlined_call_operand.vmem [shape: f32[8,64], index: 0, kind: input, shape index: {}]   ;;  %s230_s3 = inlined_call_operand.vmem [shape: f32[8,64], index: 3, kind: output, shape index: {}]  }
   0x1   :  { %v148_v2 = vld [vmem:[%s227_s1] ss:$0 sm:$0xff]  ;;  %v171_v24 = vmov 2102212464   ;;  %v172_v26 = vmov 920167782  }
   0x2   :  { %v16_v1 = vshrl.u32 %v15_v0, 7  ;;  %v149_v4 = vld [vmem:[%s228_s2] ss:$0 sm:$0xff]  ;;  %v173_v33 = vmov 1326507024   ;;  %vm142_vm13 = vcmask 523264  }
   0x4   :  { %v19_v3 = vcvt.s32.f32 %v16_v1 }
   0x6   :  { %v27_v5 = vmul.f32 %v148_v2, %v19_v3 }
   0x8   :  { %v200_v6 = vadd.f32 %v149_v4, %v27_v5 }
   0xa   :  { %v39_v7 = vand.u32 2139095040, %v200_v6  ;;  %v36_v9 = vand.u32 2147483647, %v200_v6  ;;  %vm38_vm7 = vcmp.lt.s32.totalorder %v200_v6, 0  ;;  %vm128_vm12 = vweird.f32 %v200_v6 }
   0xc   :  { %v40_v8 = vshrl.u32 %v39_v7, 23  ;;  %v43_v12 = vand.u32 8388607, %v36_v9  ;;  %vm37_vm8 = vcmp.le.f32.partialorder %v36_v9, 0.7853982 }
   0xe   :  { %v150_v10 = vadd.s32 4294967169, %v40_v8  ;;  %v44_v15 = vor.u32 8388608, %v43_v12 }
  0x10   :  { %v46_v11 = vadd.s32 1, %v150_v10  ;;  %v84_v35 = vshll.u32 %v44_v15, 8 }
  0x12   :  { %vm47_vm0 = vcmp.gt.s32.totalorder %v46_v11, 0 }
  0x13   :  { %v48_v13 = vsel %vm47_vm0, %v46_v11, 0 }
  0x14   :  { %v50_v14 = vand.u32 31, %v48_v13  ;;  %v49_v16 = vshrl.u32 %v48_v13, 5 }
  0x16   :  { %v51_v17 = vsub.s32 32, %v50_v14  ;;  %v53_v19 = vshll.u32 %v168_v18, %v50_v14  ;;  %v56_v21 = vshll.u32 %v169_v20, %v50_v14  ;;  %v59_v23 = vshll.u32 %v170_v22, %v50_v14 }
  0x17   :  { %v62_v25 = vshll.u32 %v171_v24, %v50_v14  ;;  %v65_v27 = vshll.u32 %v172_v26, %v50_v14  ;;  %vm68_vm1 = vcmp.lt.s32.totalorder %v49_v16, 1  ;;  %vm71_vm2 = vcmp.lt.s32.totalorder %v49_v16, 4 }
  0x18   :  { %v52_v28 = vshrl.u32 %v168_v18, %v51_v17  ;;  %v54_v29 = vshrl.u32 %v169_v20, %v51_v17  ;;  %v57_v30 = vshrl.u32 %v170_v22, %v51_v17  ;;  %v60_v31 = vshrl.u32 %v171_v24, %v51_v17 }
  0x19   :  { %v63_v32 = vshrl.u32 %v172_v26, %v51_v17  ;;  %v66_v34 = vshrl.u32 %v173_v33, %v51_v17  ;;  %vm69_vm3 = vcmp.lt.s32.totalorder %v49_v16, 2  ;;  %vm70_vm4 = vcmp.lt.s32.totalorder %v49_v16, 3  ;;  %v140_v33 = vld [vmem:[%s229_s0] sm:$0xff] }
  0x1a   :  { %v55_v36 = vor.u32 %v54_v29, %v53_v19  ;;  %v58_v37 = vor.u32 %v57_v30, %v56_v21  ;;  %v61_v38 = vor.u32 %v60_v31, %v59_v23 }
  0x1b   :  { %v64_v39 = vor.u32 %v63_v32, %v62_v25  ;;  %v67_v40 = vor.u32 %v66_v34, %v65_v27 }
  0x1c   :  { %v72_v41 = vsel %vm68_vm1, %v52_v28, %v55_v36  ;;  %v73_v42 = vsel %vm71_vm2, %v61_v38, 2102212464  ;;  %v76_v43 = vsel %vm68_vm1, %v55_v36, %v58_v37  ;;  %v80_v44 = vsel %vm68_vm1, %v58_v37, %v61_v38 }
  0x1d   :  { %v74_v45 = vsel %vm70_vm4, %v58_v37, %v73_v42  ;;  %v77_v46 = vsel %vm71_vm2, %v64_v39, 920167782  ;;  %v81_v47 = vsel %vm71_vm2, %v67_v40, 1326507024 }
  0x1e   :  { %v78_v48 = vsel %vm70_vm4, %v61_v38, %v77_v46  ;;  %v82_v49 = vsel %vm70_vm4, %v64_v39, %v81_v47  ;;  %v75_v50 = vsel %vm69_vm3, %v72_v41, %v74_v45 }
  0x1f   :  { %v79_v51 = vsel %vm69_vm3, %v76_v43, %v78_v48  ;;  %v83_v52 = vsel %vm69_vm3, %v80_v44, %v82_v49  ;;  %v91_v57 = vmul.u32 %v84_v35, %v75_v50 }
  0x20   :  { %v206_v53 = vmul.u32.u64.low %v84_v35, %v83_v52  ;;  %v207_v54 = vmul.u32.u64.high %v84_v35, %v83_v52, %v206_v53  ;;  %v209_v55 = vmul.u32.u64.low %v84_v35, %v79_v51  ;;  %v210_v56 = vmul.u32.u64.high %v84_v35, %v79_v51, %v209_v55 }
  0x22   :  { %vm93_vm5 = vc.u32 %v207_v54, %v209_v55  ;;  %v94_v58 = vadd.s32 1, %v210_v56  ;;  %v92_v5 = vadd.s32 %v209_v55, %v207_v54 }
  0x24   :  { %v95_v59 = vsel %vm93_vm5, %v94_v58, %v210_v56 }
  0x25   :  { %v96_v60 = vadd.s32 %v95_v59, %v91_v57 }
  0x27   :  { %v97_v61 = vadd.s32 536870912, %v96_v60 }
  0x29   :  { %v98_v62 = vshrl.u32 %v97_v61, 30 }
  0x2b   :  { %v99_v63 = vshll.u32 %v98_v62, 30  ;;  %v122_v19 = vsub.s32 4, %v98_v62 }
  0x2d   :  { %v100_v0 = vsub.s32 %v96_v60, %v99_v63  ;;  %v123_v22 = vsel %vm38_vm7, %v122_v19, %v98_v62 }
  0x2e   :  { %v125_v25 = vsel %vm37_vm8, 0, %v123_v22 }
  0x2f   :  { %v102_v1 = vsub.s32 0, %v100_v0  ;;  %v129_v26 = vadd.s32 3, %v125_v25 }
  0x31   :  { %v151_v2 = vmin.u32 %v102_v1, %v100_v0  ;;  %v130_v27 = vand.u32 3, %v129_v26 }
  0x33   :  { %v104_v3 = vclz %v151_v2  ;;  %vm135_vm9 = vcmp.eq.s32.totalorder %v130_v27, 2  ;;  %vm132_vm10 = vcmp.eq.s32.totalorder %v130_v27, 0  ;;  %vm131_vm11 = vcmp.lt.s32.totalorder %v130_v27, 2 }
  0x35   :  { %v152_v4 = vadd.s32 4294967294, %v104_v3 }
  0x37   :  { %vm153_vm6 = vcmp.lt.s32.totalorder %v152_v4, 0 }
  0x38   :  { %v107_v7 = vsel %vm153_vm6, 0, %v152_v4 }
  0x39   :  { %v108_v8 = vsub.s32 32, %v107_v7  ;;  %v109_v10 = vshll.u32 %v100_v0, %v107_v7  ;;  %v112_v11 = vsub.s32 4294967266, %v107_v7 }
  0x3b   :  { %v110_v12 = vshrl.u32 %v92_v5, %v108_v8  ;;  %v113_v13 = vadd.s32 127, %v112_v11 }
  0x3d   :  { %v111_v14 = vor.u32 %v110_v12, %v109_v10  ;;  %v114_v15 = vshll.u32 %v113_v13, 23 }
  0x3f   :  { %v115_v16 = vor.u32 4788187, %v114_v15  ;;  %v118_v17 = vcvt.s32.f32 %v111_v14 }
  0x41   :  { %v116_v18 = vand.u32 2147483647, %v115_v16 }
  0x43   :  { %v119_v20 = vmul.f32 %v118_v17, %v116_v18 }
  0x45   :  { %v120_v21 = vxor.u32 2147483648, %v119_v20 }
  0x47   :  { %v121_v23 = vsel %vm38_vm7, %v120_v21, %v119_v20 }
  0x48   :  { %v124_v24 = vsel %vm37_vm8, %v200_v6, %v121_v23 }
  0x49   :  { %164 = vcosq.f32 %v124_v24 }
  0x4a   :  { %166 = vsinq.f32 %v124_v24 }
  0x53   :  { %v165_v28 = vpop.eup %164 }
  0x54   :  { %v167_v29 = vpop.eup %166  ;;  %v136_v30 = vxor.u32 2147483648, %v165_v28 }
  0x55   :  { %v133_v31 = vxor.u32 2147483648, %v167_v29 }
  0x56   :  { %v137_v9 = vsel %vm135_vm9, %v136_v30, %v167_v29 }
  0x57   :  { %v134_v32 = vsel %vm132_vm10, %v165_v28, %v133_v31 }
  0x58   :  { %v138_v34 = vsel %vm131_vm11, %v134_v32, %v137_v9 }
  0x59   :  { %v139_v35 = vsel %vm128_vm12, nan, %v138_v34 }
  0x5a   :  { %v141_v36 = vadd.f32 %v140_v33, %v139_v35 }
  0x5c   :  { %143 = vst.msk [vmem:[%s230_s3] sm:$0xff] %vm142_vm13, %v141_v36 }

</bundles_post_ra>
